<compile_context>
chip_gen: v7x
topology: tpu7x:2x2x1
jax: 0.10.0
libtpu: 0.0.40
codegen_flags: <defaults>
</compile_context>

<pallas_src>
import functools
import math

import jax
import jax.numpy as jnp
from jax import lax
from jax.experimental import pallas as pl
from jax.experimental.pallas import tpu as pltpu

_SQRT_2_OVER_PI = math.sqrt(2.0 / math.pi)
_INV_SQRT_2 = 1.0 / math.sqrt(2.0)


def _gelu(x, approx):
    if approx:
        # tanh approximation -> EUP (its own VLIW slot), ~3e-4 max abs error.
        return 0.5 * x * (1.0 + jnp.tanh(_SQRT_2_OVER_PI * (x + 0.044715 * x * x * x)))
    # PyTorch nn.GELU() default (erf-based, exact).
    return 0.5 * x * (1.0 + lax.erf(x * _INV_SQRT_2))


def latent_decoder_kernel(wa_ref,            # (1,) SMEM: softmax weight w[0]
                          x_ref,             # (TM, Dp) input rows
                          w1_ref, b1_ref,    # (Dp, Dp), (1, Dp)  LN affine folded in
                          w2_ref, b2_ref,    # (Dp, Dp), (1, Dp)
                          w3_ref, b3_ref,    # (Dp, Dp), (1, Dp)  wc*W3 + wb*I folded in
                          o_ref,             # (TM, Dp)
                          *, d_true, approx_gelu):
    x = x_ref[...].astype(jnp.float32)
    dp = x.shape[-1]

    # --- LayerNorm statistics over the true latent_dim (padded lanes are 0) ---
    inv_d = 1.0 / d_true
    mean = jnp.sum(x, axis=-1, keepdims=True) * inv_d
    xc = x - mean
    if d_true != dp:
        lane = lax.broadcasted_iota(jnp.int32, x.shape, 1)
        xc = jnp.where(lane < d_true, xc, 0.0)
    var = jnp.sum(xc * xc, axis=-1, keepdims=True) * inv_d
    s0 = xc * lax.rsqrt(var + 1e-5)          # gamma/beta already folded into W1'/b1'

    mm = w1_ref.dtype                         # bf16 (default) or f32 (exact path)

    # fc1 -> GELU
    s1 = _gelu(jnp.dot(s0.astype(mm), w1_ref[...],
                       preferred_element_type=jnp.float32) + b1_ref[...],
               approx_gelu)
    # fc2 -> GELU
    s2 = _gelu(jnp.dot(s1.astype(mm), w2_ref[...],
                       preferred_element_type=jnp.float32) + b2_ref[...],
               approx_gelu)
    # W3' = wc*W3 + wb*I, b3' = wc*b3 -> this dot already carries wb*s2 + wc*s3.
    out = jnp.dot(s2.astype(mm), w3_ref[...],
                  preferred_element_type=jnp.float32) + b3_ref[...]
    o_ref[...] = (out + wa_ref[0] * s1).astype(o_ref.dtype)


def _round_up(x, m):
    return ((x + m - 1) // m) * m


def _vmem_budget_bytes():
    cap = 128 << 20
    try:
        cap = int(pltpu.get_tpu_info().vmem_capacity_bytes)
    except Exception:  # hardware query unavailable (e.g. interpret/emulation)
        pass
    # ~75% of physical VMEM: 48 MiB on 64-MiB v7x parts, 96 MiB on v5e/v6e.
    return max((cap * 3) // 4, 32 << 20)


def _pick_tm(M, Dp, budget, weight_bytes):
    # Per-row VMEM: x/out tiles double-buffered (4 blocks) + ~5 live f32
    # intermediates + cast copies -> ~13 f32 blocks of Dp lanes (conservative).
    per_row = 13 * Dp * 4
    avail = max(budget - weight_bytes - (4 << 20), 8 * per_row)
    cap_rows = max((avail // per_row) // 8 * 8, 8)
    if Dp <= 128:          # tiny D: per-step overhead dominates -> huge row tiles
        target = 4096
    elif Dp <= 512:
        target = 1024
    else:
        target = 512
    tm = max(min(cap_rows, target, _round_up(M, 8)), 8)
    # Keep >=2 (and even) grid steps when there is enough work so the
    # "parallel" row grid splits evenly across both v7x TensorCores.
    steps = pl.cdiv(M, tm)
    if M >= 512:
        steps = max(steps, 2)
    if steps > 1:
        steps = _round_up(steps, 2)
    return _round_up(pl.cdiv(M, steps), 8)


def _vmem_limit_bytes(tm, Dp, weight_bytes, budget):
    est = (weight_bytes                      # resident weights + biases
           + 4 * tm * Dp * 4                 # x + out tiles, double-buffered
           + 5 * tm * Dp * 4                 # live f32 intermediates
           + (4 << 20))                      # compiler headroom
    # TODO(synk): for very large latent_dim (weights alone >~ budget) tile the
    # matmul K/N dimensions instead of just raising the scoped-VMEM limit.
    return int(min(max(est, 32 << 20), budget))


def prepare_params(params, *, matmul_dtype=jnp.bfloat16):
    """One-time parameter prep: transpose to (in,out), fold the LayerNorm
    affine into fc1, fold the softmax mixture of s2/s3 into fc3, pad
    latent_dim to a lane-dense multiple of 128, cast matmul weights."""
    D = params["fc1_w"].shape[0]
    Dp = _round_up(D, 128)

    w = jax.nn.softmax(params["weight_logits"].astype(jnp.float32), axis=0)
    wa, wb, wc = w[0], w[1], w[2]

    gamma = params["ln_gamma"].astype(jnp.float32)
    beta = params["ln_beta"].astype(jnp.float32)
    w1t = params["fc1_w"].astype(jnp.float32).T    # (in, out): x @ W.T == x @ w1t
    w2t = params["fc2_w"].astype(jnp.float32).T
    w3t = params["fc3_w"].astype(jnp.float32).T
    b1 = params["fc1_b"].astype(jnp.float32)
    b2 = params["fc2_b"].astype(jnp.float32)
    b3 = params["fc3_b"].astype(jnp.float32)

    # (gamma*xhat + beta) @ W1.T + b1 == xhat @ (diag(gamma) W1.T) + (beta @ W1.T + b1)
    w1f = gamma[:, None] * w1t
    b1f = beta @ w1t + b1
    # wa*s1 + wb*s2 + wc*(s2 @ W3.T + b3) == wa*s1 + s2 @ (wc*W3.T + wb*I) + wc*b3
    w3f = wc * w3t + wb * jnp.eye(D, dtype=jnp.float32)
    b3f = wc * b3

    def mat(m):
        if Dp != D:
            m = jnp.pad(m, ((0, Dp - D), (0, Dp - D)))
        return m.astype(matmul_dtype)

    def vec(v):
        if Dp != D:
            v = jnp.pad(v, ((0, Dp - D),))
        return v.reshape(1, Dp).astype(jnp.float32)

    return {
        "wa": jnp.reshape(wa, (1,)).astype(jnp.float32),
        "w1": mat(w1f), "b1": vec(b1f),
        "w2": mat(w2t), "b2": vec(b2),
        "w3": mat(w3f), "b3": vec(b3f),
    }


def latent_decoder(sL, prep, *, approx_gelu=True, tm=None):
    """sL: (batch, seq_len, latent_dim). prep: output of prepare_params."""
    B, S, D = sL.shape
    Dp = prep["w1"].shape[0]
    M = B * S

    x2d = sL.reshape(M, D).astype(jnp.float32)
    if Dp != D:
        x2d = jnp.pad(x2d, ((0, 0), (0, Dp - D)))   # lane-dense blocks

    w_itemsize = prep["w1"].dtype.itemsize
    weights_one = 3 * Dp * Dp * w_itemsize + 3 * Dp * 4
    budget = _vmem_budget_bytes()
    # Single-buffer the grid-invariant weights only when double-buffering them
    # would eat a large chunk of the VMEM budget (feature check, no try/except).
    single_buf = hasattr(pl, "Buffered") and (2 * weights_one > budget // 3)
    weight_bytes = weights_one * (1 if single_buf else 2)

    if tm is None:
        tm = _pick_tm(M, Dp, budget, weight_bytes)
    tm = max(_round_up(min(tm, _round_up(M, 8)), 8), 8)
    grid = (pl.cdiv(M, tm),)

    row_spec = pl.BlockSpec((tm, Dp), lambda i: (i, 0))
    if single_buf:
        mat_spec = pl.BlockSpec((Dp, Dp), lambda i: (0, 0), pipeline_mode=pl.Buffered(1))
        vec_spec = pl.BlockSpec((1, Dp), lambda i: (0, 0), pipeline_mode=pl.Buffered(1))
    else:
        mat_spec = pl.BlockSpec((Dp, Dp), lambda i: (0, 0))
        vec_spec = pl.BlockSpec((1, Dp), lambda i: (0, 0))

    kernel = functools.partial(latent_decoder_kernel, d_true=D,
                               approx_gelu=approx_gelu)
    out2d = pl.pallas_call(
        kernel,
        out_shape=jax.ShapeDtypeStruct((M, Dp), sL.dtype),
        grid=grid,
        in_specs=[
            pl.BlockSpec(memory_space=pltpu.SMEM),   # wa scalar
            row_spec,                                # x rows
            mat_spec, vec_spec,                      # w1', b1'
            mat_spec, vec_spec,                      # w2,  b2
            mat_spec, vec_spec,                      # w3', b3'
        ],
        out_specs=row_spec,
        compiler_params=pltpu.CompilerParams(
            dimension_semantics=("parallel",),
            vmem_limit_bytes=_vmem_limit_bytes(tm, Dp, weight_bytes, budget)),
    )(prep["wa"], x2d, prep["w1"], prep["b1"], prep["w2"], prep["b2"],
      prep["w3"], prep["b3"])

    if Dp != D:
        out2d = out2d[:, :D]
    return out2d.reshape(B, S, D)


def init_params(key, latent_dim):
    ks = jax.random.split(key, 8)
    D = latent_dim
    lim = 1.0 / math.sqrt(D)  # PyTorch Linear default init range
    return {
        "ln_gamma": jnp.ones((D,), jnp.float32),
        "ln_beta": jnp.zeros((D,), jnp.float32),
        "fc1_w": jax.random.uniform(ks[0], (D, D), jnp.float32, -lim, lim),
        "fc1_b": jax.random.uniform(ks[1], (D,), jnp.float32, -lim, lim),
        "fc2_w": jax.random.uniform(ks[2], (D, D), jnp.float32, -lim, lim),
        "fc2_b": jax.random.uniform(ks[3], (D,), jnp.float32, -lim, lim),
        "fc3_w": jax.random.uniform(ks[4], (D, D), jnp.float32, -lim, lim),
        "fc3_b": jax.random.uniform(ks[5], (D,), jnp.float32, -lim, lim),
        "weight_logits": jax.random.normal(ks[6], (3,), jnp.float32),
    }


def reference(sL, params):
    """Pure-JAX reference mirroring the PyTorch forward (exact GELU, f32)."""
    mean = jnp.mean(sL, axis=-1, keepdims=True)
    var = jnp.mean((sL - mean) ** 2, axis=-1, keepdims=True)
    s0 = (sL - mean) / jnp.sqrt(var + 1e-5) * params["ln_gamma"] + params["ln_beta"]
    s1 = jax.nn.gelu(s0 @ params["fc1_w"].T + params["fc1_b"], approximate=False)
    s2 = jax.nn.gelu(s1 @ params["fc2_w"].T + params["fc2_b"], approximate=False)
    s3 = s2 @ params["fc3_w"].T + params["fc3_b"]
    w = jax.nn.softmax(params["weight_logits"], axis=0)
    return w[0] * s1 + w[1] * s2 + w[2] * s3


if __name__ == "__main__":
    key = jax.random.PRNGKey(0)
    k_x, k_p, k_x2 = jax.random.split(key, 3)

    batch, seq_len, latent_dim = 2, 8, 32
    sL = jax.random.normal(k_x, (batch, seq_len, latent_dim), jnp.float32)
    params = init_params(k_p, latent_dim)
    ref = reference(sL, params)

    # 1) Numerically-faithful path (f32 matmuls + exact erf GELU): verifies the
    #    fused kernel math against the PyTorch-equivalent reference.
    prep_f32 = prepare_params(params, matmul_dtype=jnp.float32)
    out_exact = jax.block_until_ready(
        latent_decoder(sL, prep_f32, approx_gelu=False))
    assert out_exact.shape == sL.shape
    assert jnp.allclose(out_exact, ref, atol=1e-4, rtol=1e-4), float(
        jnp.max(jnp.abs(out_exact - ref)))

    # 2) Optimized default path: bf16 MXU matmuls w/ f32 accumulation + tanh GELU.
    prep = prepare_params(params)
    decode = jax.jit(latent_decoder)
    out = jax.block_until_ready(decode(sL, prep))
    assert out.shape == sL.shape
    assert jnp.allclose(out, ref, atol=5e-2, rtol=5e-2), float(
        jnp.max(jnp.abs(out - ref)))

    # 3) Bigger shape: multi-step (even) row grid + lane-padded D path.
    sL_big = jax.random.normal(k_x2, (4, 300, latent_dim), jnp.float32)
    out_big = jax.block_until_ready(decode(sL_big, prep))
    ref_big = reference(sL_big, params)
    assert out_big.shape == sL_big.shape
    assert jnp.allclose(out_big, ref_big, atol=5e-2, rtol=5e-2), float(
        jnp.max(jnp.abs(out_big - ref_big)))

    print("KERNEL_OK")
</pallas_src>

<mosaic_0001>
module attributes {stable_mosaic.version = 11 : i64} {
  func.func @latent_decoder_kernel(%arg0: i32, %arg1: memref<1xf32, #tpu.memory_space<smem>>, %arg2: memref<16x128xf32, #tpu.memory_space<vmem>>, %arg3: memref<128x128xf32, #tpu.memory_space<vmem>>, %arg4: memref<1x128xf32, #tpu.memory_space<vmem>>, %arg5: memref<128x128xf32, #tpu.memory_space<vmem>>, %arg6: memref<1x128xf32, #tpu.memory_space<vmem>>, %arg7: memref<128x128xf32, #tpu.memory_space<vmem>>, %arg8: memref<1x128xf32, #tpu.memory_space<vmem>>, %arg9: memref<16x128xf32, #tpu.memory_space<vmem>>) attributes {dimension_semantics = [#tpu.dimension_semantics<parallel>], iteration_bounds = array<i64: 1>, scalar_prefetch = 0 : i64, scratch_operands = 0 : i64, tpu.core_type = #tpu.core_type<tc>, window_params = [{transform_indices = @transform_0, window_bounds = array<i64: 1>}, {transform_indices = @transform_1, window_bounds = array<i64: 16, 128>}, {pipeline_mode = #tpu.pipeline_mode<synchronous>, transform_indices = @transform_2, window_bounds = array<i64: 128, 128>}, {pipeline_mode = #tpu.pipeline_mode<synchronous>, transform_indices = @transform_3, window_bounds = array<i64: 1, 128>}, {pipeline_mode = #tpu.pipeline_mode<synchronous>, transform_indices = @transform_4, window_bounds = array<i64: 128, 128>}, {pipeline_mode = #tpu.pipeline_mode<synchronous>, transform_indices = @transform_5, window_bounds = array<i64: 1, 128>}, {pipeline_mode = #tpu.pipeline_mode<synchronous>, transform_indices = @transform_6, window_bounds = array<i64: 128, 128>}, {pipeline_mode = #tpu.pipeline_mode<synchronous>, transform_indices = @transform_7, window_bounds = array<i64: 1, 128>}, {transform_indices = @transform_8, window_bounds = array<i64: 16, 128>}]} {
    %c0 = arith.constant 0 : index
    %c0_0 = arith.constant 0 : index
    %0 = vector.load %arg2[%c0, %c0_0] : memref<16x128xf32, #tpu.memory_space<vmem>>, vector<16x128xf32>
    %cst = arith.constant dense<0.000000e+00> : vector<16xf32>
    %1 = vector.multi_reduction <add>, %0, %cst [1] : vector<16x128xf32> to vector<16xf32>
    %2 = vector.shape_cast %1 : vector<16xf32> to vector<16x1xf32>
    %cst_1 = arith.constant 3.125000e-02 : f32
    %3 = vector.broadcast %cst_1 : f32 to vector<16x1xf32>
    %4 = arith.mulf %2, %3 : vector<16x1xf32>
    %5 = vector.broadcast %4 : vector<16x1xf32> to vector<16x128xf32>
    %6 = arith.subf %0, %5 : vector<16x128xf32>
    %7 = tpu.iota {dimensions = array<i32: 1>} : vector<16x128xi32>
    %c32_i32 = arith.constant 32 : i32
    %8 = vector.broadcast %c32_i32 : i32 to vector<16x128xi32>
    %9 = arith.cmpi slt, %7, %8 : vector<16x128xi32>
    %cst_2 = arith.constant 0.000000e+00 : f32
    %10 = vector.broadcast %cst_2 : f32 to vector<16x128xf32>
    %11 = arith.select %9, %6, %10 : vector<16x128xi1>, vector<16x128xf32>
    %12 = arith.mulf %11, %11 : vector<16x128xf32>
    %cst_3 = arith.constant dense<0.000000e+00> : vector<16xf32>
    %13 = vector.multi_reduction <add>, %12, %cst_3 [1] : vector<16x128xf32> to vector<16xf32>
    %14 = vector.shape_cast %13 : vector<16xf32> to vector<16x1xf32>
    %cst_4 = arith.constant 3.125000e-02 : f32
    %15 = vector.broadcast %cst_4 : f32 to vector<16x1xf32>
    %16 = arith.mulf %14, %15 : vector<16x1xf32>
    %cst_5 = arith.constant 9.99999974E-6 : f32
    %17 = vector.broadcast %cst_5 : f32 to vector<16x1xf32>
    %18 = arith.addf %16, %17 : vector<16x1xf32>
    %19 = math.rsqrt %18 : vector<16x1xf32>
    %20 = vector.broadcast %19 : vector<16x1xf32> to vector<16x128xf32>
    %21 = arith.mulf %11, %20 : vector<16x128xf32>
    %c0_6 = arith.constant 0 : index
    %c0_7 = arith.constant 0 : index
    %22 = vector.load %arg3[%c0_6, %c0_7] : memref<128x128xf32, #tpu.memory_space<vmem>>, vector<128x128xf32>
    %cst_8 = arith.constant dense<0.000000e+00> : vector<16x128xf32>
    %23 = tpu.matmul %21, %22, %cst_8 {dimension_numbers = #tpu.dot_dimension_numbers<[1], [0], [0], [1], [0, 0, 1, 1], [], []>} : vector<16x128xf32>, vector<128x128xf32>, vector<16x128xf32> -> vector<16x128xf32>
    %c0_9 = arith.constant 0 : index
    %c0_10 = arith.constant 0 : index
    %24 = vector.load %arg4[%c0_9, %c0_10] : memref<1x128xf32, #tpu.memory_space<vmem>>, vector<1x128xf32>
    %25 = vector.broadcast %24 : vector<1x128xf32> to vector<16x128xf32>
    %26 = arith.addf %23, %25 : vector<16x128xf32>
    %cst_11 = arith.constant 5.000000e-01 : f32
    %27 = vector.broadcast %cst_11 : f32 to vector<16x128xf32>
    %28 = arith.mulf %27, %26 : vector<16x128xf32>
    %cst_12 = arith.constant 0.707106769 : f32
    %29 = vector.broadcast %cst_12 : f32 to vector<16x128xf32>
    %30 = arith.mulf %26, %29 : vector<16x128xf32>
    %31 = math.erf %30 : vector<16x128xf32>
    %cst_13 = arith.constant 1.000000e+00 : f32
    %32 = vector.broadcast %cst_13 : f32 to vector<16x128xf32>
    %33 = arith.addf %32, %31 : vector<16x128xf32>
    %34 = arith.mulf %28, %33 : vector<16x128xf32>
    %c0_14 = arith.constant 0 : index
    %c0_15 = arith.constant 0 : index
    %35 = vector.load %arg5[%c0_14, %c0_15] : memref<128x128xf32, #tpu.memory_space<vmem>>, vector<128x128xf32>
    %cst_16 = arith.constant dense<0.000000e+00> : vector<16x128xf32>
    %36 = tpu.matmul %34, %35, %cst_16 {dimension_numbers = #tpu.dot_dimension_numbers<[1], [0], [0], [1], [0, 0, 1, 1], [], []>} : vector<16x128xf32>, vector<128x128xf32>, vector<16x128xf32> -> vector<16x128xf32>
    %c0_17 = arith.constant 0 : index
    %c0_18 = arith.constant 0 : index
    %37 = vector.load %arg6[%c0_17, %c0_18] : memref<1x128xf32, #tpu.memory_space<vmem>>, vector<1x128xf32>
    %38 = vector.broadcast %37 : vector<1x128xf32> to vector<16x128xf32>
    %39 = arith.addf %36, %38 : vector<16x128xf32>
    %cst_19 = arith.constant 5.000000e-01 : f32
    %40 = vector.broadcast %cst_19 : f32 to vector<16x128xf32>
    %41 = arith.mulf %40, %39 : vector<16x128xf32>
    %cst_20 = arith.constant 0.707106769 : f32
    %42 = vector.broadcast %cst_20 : f32 to vector<16x128xf32>
    %43 = arith.mulf %39, %42 : vector<16x128xf32>
    %44 = math.erf %43 : vector<16x128xf32>
    %cst_21 = arith.constant 1.000000e+00 : f32
    %45 = vector.broadcast %cst_21 : f32 to vector<16x128xf32>
    %46 = arith.addf %45, %44 : vector<16x128xf32>
    %47 = arith.mulf %41, %46 : vector<16x128xf32>
    %c0_22 = arith.constant 0 : index
    %c0_23 = arith.constant 0 : index
    %48 = vector.load %arg7[%c0_22, %c0_23] : memref<128x128xf32, #tpu.memory_space<vmem>>, vector<128x128xf32>
    %cst_24 = arith.constant dense<0.000000e+00> : vector<16x128xf32>
    %49 = tpu.matmul %47, %48, %cst_24 {dimension_numbers = #tpu.dot_dimension_numbers<[1], [0], [0], [1], [0, 0, 1, 1], [], []>} : vector<16x128xf32>, vector<128x128xf32>, vector<16x128xf32> -> vector<16x128xf32>
    %c0_25 = arith.constant 0 : index
    %c0_26 = arith.constant 0 : index
    %50 = vector.load %arg8[%c0_25, %c0_26] : memref<1x128xf32, #tpu.memory_space<vmem>>, vector<1x128xf32>
    %51 = vector.broadcast %50 : vector<1x128xf32> to vector<16x128xf32>
    %52 = arith.addf %49, %51 : vector<16x128xf32>
    %c0_27 = arith.constant 0 : index
    %53 = memref.load %arg1[%c0_27] : memref<1xf32, #tpu.memory_space<smem>>
    %54 = vector.broadcast %53 : f32 to vector<16x128xf32>
    %55 = arith.mulf %54, %34 : vector<16x128xf32>
    %56 = arith.addf %52, %55 : vector<16x128xf32>
    %c0_28 = arith.constant 0 : index
    %c0_29 = arith.constant 0 : index
    %57 = vector.load %arg9[%c0_28, %c0_29] : memref<16x128xf32, #tpu.memory_space<vmem>>, vector<16x128xf32>
    tpu.vector_store %arg9[%c0_28, %c0_29], %56 {strides = array<i32>} : memref<16x128xf32, #tpu.memory_space<vmem>>, vector<16x128xf32>,
    return
  }
  func.func @transform_0(%arg0: i32) -> i32 {
    %c0_i32 = arith.constant 0 : i32
    %c0_i32_0 = arith.constant 0 : i32
    return %c0_i32 : i32
  }
  func.func @transform_1(%arg0: i32) -> (i32, i32) {
    %c0_i32 = arith.constant 0 : i32
    %c0_i32_0 = arith.constant 0 : i32
    return %arg0, %c0_i32 : i32, i32
  }
  func.func @transform_2(%arg0: i32) -> (i32, i32) {
    %c0_i32 = arith.constant 0 : i32
    %c0_i32_0 = arith.constant 0 : i32
    %c0_i32_1 = arith.constant 0 : i32
    return %c0_i32, %c0_i32_0 : i32, i32
  }
  func.func @transform_3(%arg0: i32) -> (i32, i32) {
    %c0_i32 = arith.constant 0 : i32
    %c0_i32_0 = arith.constant 0 : i32
    %c0_i32_1 = arith.constant 0 : i32
    return %c0_i32, %c0_i32_0 : i32, i32
  }
  func.func @transform_4(%arg0: i32) -> (i32, i32) {
    %c0_i32 = arith.constant 0 : i32
    %c0_i32_0 = arith.constant 0 : i32
    %c0_i32_1 = arith.constant 0 : i32
    return %c0_i32, %c0_i32_0 : i32, i32
  }
  func.func @transform_5(%arg0: i32) -> (i32, i32) {
    %c0_i32 = arith.constant 0 : i32
    %c0_i32_0 = arith.constant 0 : i32
    %c0_i32_1 = arith.constant 0 : i32
    return %c0_i32, %c0_i32_0 : i32, i32
  }
  func.func @transform_6(%arg0: i32) -> (i32, i32) {
    %c0_i32 = arith.constant 0 : i32
    %c0_i32_0 = arith.constant 0 : i32
    %c0_i32_1 = arith.constant 0 : i32
    return %c0_i32, %c0_i32_0 : i32, i32
  }
  func.func @transform_7(%arg0: i32) -> (i32, i32) {
    %c0_i32 = arith.constant 0 : i32
    %c0_i32_0 = arith.constant 0 : i32
    %c0_i32_1 = arith.constant 0 : i32
    return %c0_i32, %c0_i32_0 : i32, i32
  }
  func.func @transform_8(%arg0: i32) -> (i32, i32) {
    %c0_i32 = arith.constant 0 : i32
    %c0_i32_0 = arith.constant 0 : i32
    return %arg0, %c0_i32 : i32, i32
  }
}

</mosaic_0001>

<bundles_post_ra>
// kernel: tpu_custom_call.1
= control target key start
LH: loop header
LB: loop body
LE: loop exit
PB: predicated region body
PF: predicated region fallthrough
CT: control target
= control target key end

     0   :  { %14 = vsyncpa [#allocation4], 0  ;;  %s1004_s0 = inlined_call_operand.<no memory space> [shape: f32[1], index: 0, kind: input, shape index: {}]   ;;  %s1005_s1 = inlined_call_operand.hbm [shape: f32[16,128], index: 1, kind: input, shape index: {}]   ;;  %s1006_s2 = inlined_call_operand.hbm [shape: f32[128,128], index: 2, kind: input, shape index: {}]   ;;  %s1007_s3 = inlined_call_operand.vmem [shape: f32[1,128], index: 3, kind: input, shape index: {}]   ;;  %s1008_s4 = inlined_call_operand.hbm [shape: f32[128,128], index: 4, kind: input, shape index: {}]   ;;  %s1009_s5 = inlined_call_operand.vmem [shape: f32[1,128], index: 5, kind: input, shape index: {}]   ;;  %s1010_s6 = inlined_call_operand.hbm [shape: f32[128,128], index: 6, kind: input, shape index: {}]   ;;  %s1011_s7 = inlined_call_operand.vmem [shape: f32[1,128], index: 7, kind: input, shape index: {}]   ;;  %s1012_s8 = inlined_call_operand.hbm [shape: f32[16,128], index: 8, kind: output, shape index: {}]  }
   0x1   :  { %15 = vsyncpa [#allocation7], 0 }
   0x2   :  { %16 = vsyncpa [#allocation10], 0 }
   0x3   :  { %17 = vsyncpa [#allocation5], 0  ;;  %s851_s27 = smov [#allocation6]   ;;  %s852_s29 = smov [#allocation3]  }
   0x4   :  { %s37_s28 = sshll.u32 %s851_s27, 4  ;;  %s25_s30 = sshll.u32 %s852_s29, 4  ;;  %s38_s28 = int_to_ptr.vmem [resolvable:$true] %s37_s28  ;;  %s903_s30 = int_to_ptr.vmem [resolvable:$true] %s25_s30 }
   0x5   :  { %s733_s11 = scalar_lea.hbm %s1006_s2, 2048 }
   0x6   :  { %p734_p0 = scmp.ne.s32.totalorder %s1006_s2, %s733_s11  ;;  %p737_p1 = scmp.lt.u32.totalorder %s733_s11, %s1006_s2 }
   0x8   :  { %p739_p2 = pnand %p737_p1, %p734_p0 }
   0xa   :  { %742 = shalt.err (!%p739_p2)
}
   0xb   :  { %s743_s16 = scalar_lea.vmem %s38_s28, 2048  ;;  %p748_p4 = scmp.lt.s32.totalorder %s38_s28, %s38_s28 }
   0xc   :  { %p744_p3 = scmp.ne.s32.totalorder %s38_s28, %s743_s16  ;;  %p749_p5 = scmp.lt.s32.totalorder %s743_s16, %s743_s16 }
   0xe   :  { %p750_p6 = por %p749_p5, %p748_p4 }
  0x10   :  { %p751_p7 = pnand %p750_p6, %p744_p3 }
  0x12   :  { %754 = shalt.err (!%p751_p7)
}
  0x13   :  { %s853_s17 = smov 128   ;;  %s854_s18 = smov 8  }
  0x14   :  { %43 = dma.hbm_to_vmem [thread:$0]  %s1006_s2, 2048, %s38_s28, [#allocation7], %s853_s17, %s853_s17, %s854_s18  }
  0x15   :  { %s755_s23 = scalar_lea.hbm %s1005_s1, 256 }
  0x16   :  { %p756_p8 = scmp.ne.s32.totalorder %s1005_s1, %s755_s23  ;;  %p759_p9 = scmp.lt.u32.totalorder %s755_s23, %s1005_s1 }
  0x18   :  { %p761_p10 = pnand %p759_p9, %p756_p8 }
  0x1a   :  { %764 = shalt.err (!%p761_p10)
}
  0x1b   :  { %s765_s29 = scalar_lea.vmem %s903_s30, 256  ;;  %p770_p12 = scmp.lt.s32.totalorder %s903_s30, %s903_s30 }
  0x1c   :  { %p766_p11 = scmp.ne.s32.totalorder %s903_s30, %s765_s29  ;;  %p771_p13 = scmp.lt.s32.totalorder %s765_s29, %s765_s29 }
  0x1e   :  { %p772_p0 = por %p771_p13, %p770_p12 }
  0x20   :  { %p773_p1 = pnand %p772_p0, %p766_p11 }
  0x22   :  { %776 = shalt.err (!%p773_p1)
}
  0x23   :  { %31 = dma.hbm_to_vmem [thread:$0]  %s1005_s1, 256, %s903_s30, [#allocation4], %s853_s17, %s853_s17, %s854_s18  }
  0x24   :  { %s855_s9 = smov [#allocation8]   ;;  %s856_s11 = smov [#allocation9]  }
  0x25   :  { %s51_s10 = sshll.u32 %s855_s9, 4  ;;  %s65_s12 = sshll.u32 %s856_s11, 4  ;;  %s52_s10 = int_to_ptr.vmem [resolvable:$true] %s51_s10  ;;  %s940_s12 = int_to_ptr.vmem [resolvable:$true] %s65_s12 }
  0x26   :  { %s777_s15 = scalar_lea.hbm %s1008_s4, 2048 }
  0x27   :  { %p778_p2 = scmp.ne.s32.totalorder %s1008_s4, %s777_s15  ;;  %p781_p3 = scmp.lt.u32.totalorder %s777_s15, %s1008_s4 }
  0x29   :  { %p783_p4 = pnand %p781_p3, %p778_p2 }
  0x2b   :  { %786 = shalt.err (!%p783_p4)
}
  0x2c   :  { %s787_s1 = scalar_lea.vmem %s52_s10, 2048  ;;  %p792_p6 = scmp.lt.s32.totalorder %s52_s10, %s52_s10 }
  0x2d   :  { %p788_p5 = scmp.ne.s32.totalorder %s52_s10, %s787_s1  ;;  %p793_p7 = scmp.lt.s32.totalorder %s787_s1, %s787_s1 }
  0x2f   :  { %p794_p8 = por %p793_p7, %p792_p6 }
  0x31   :  { %p795_p9 = pnand %p794_p8, %p788_p5 }
  0x33   :  { %798 = shalt.err (!%p795_p9)
}
  0x34   :  { %57 = dma.hbm_to_vmem [thread:$0]  %s1008_s4, 2048, %s52_s10, [#allocation7], %s853_s17, %s853_s17, %s854_s18  }
  0x35   :  { %s799_s25 = scalar_lea.hbm %s1010_s6, 2048 }
  0x36   :  { %p800_p10 = scmp.ne.s32.totalorder %s1010_s6, %s799_s25  ;;  %p803_p11 = scmp.lt.u32.totalorder %s799_s25, %s1010_s6 }
  0x38   :  { %p805_p12 = pnand %p803_p11, %p800_p10 }
  0x3a   :  { %808 = shalt.err (!%p805_p12)
}
  0x3b   :  { %s809_s28 = scalar_lea.vmem %s940_s12, 2048  ;;  %p814_p0 = scmp.lt.s32.totalorder %s940_s12, %s940_s12 }
  0x3c   :  { %p810_p13 = scmp.ne.s32.totalorder %s940_s12, %s809_s28  ;;  %p815_p1 = scmp.lt.s32.totalorder %s809_s28, %s809_s28 }
  0x3e   :  { %p816_p2 = por %p815_p1, %p814_p0 }
  0x40   :  { %p817_p3 = pnand %p816_p2, %p810_p13 }
  0x42   :  { %820 = shalt.err (!%p817_p3)
}
  0x43   :  { %71 = dma.hbm_to_vmem [thread:$0]  %s1010_s6, 2048, %s940_s12, [#allocation10], %s853_s17, %s853_s17, %s854_s18  }
  0x44   :  { %843 = dma.done.wait [#allocation4], 256  }
  0x45   :  { %844 = vsyncadd [#allocation4], 4294967040 }
  0x46   :  { %845 = dma.done.wait [#allocation7], 4096  }
  0x47   :  { %846 = vsyncadd [#allocation7], 4294963200 }
  0x48   :  { %847 = dma.done.wait [#allocation10], 2048  }
  0x49   :  { %848 = vsyncadd [#allocation10], 4294965248  ;;  %v86_v0 = vld [vmem:[#allocation3] sm:$0xff]  ;;  %v87_v1 = vld [vmem:[#allocation3 + $0x8] sm:$0xff]  ;;  %v96_v11 = vlaneseq  ;;  %s857_s15 = smov [#allocation11]  }
  0x4a   :  { %88 = vadd.xlane.f32.xlu0 %v86_v0  ;;  %v115_v2 = vld [vmem:[#allocation6] sm:$0xff]  ;;  %v116_v3 = vld [vmem:[#allocation6 + $0x8] sm:$0xff]  ;;  %v117_v4 = vld [vmem:[#allocation6 + $0x10] sm:$0xff]  ;;  %s442_s16 = sshll.u32 %s857_s15, 4  ;;  %s443_s16 = int_to_ptr.vmem [resolvable:$true] %s442_s16 }
  0x4b   :  { %v618_v5 = vpack.c.bf16 %v116_v3, %v115_v2  ;;  %v118_v6 = vld [vmem:[#allocation6 + $0x18] sm:$0xff]  ;;  %v119_v8 = vld [vmem:[#allocation6 + $0x20] sm:$0xff]  ;;  %v120_v9 = vld [vmem:[#allocation6 + $0x28] sm:$0xff]  ;;  %v97_v12 = vand.u32 127, %v96_v11  ;;  %s821_s19 = scalar_lea.vmem %s443_s16, 256  ;;  %p826_p5 = scmp.lt.s32.totalorder %s443_s16, %s443_s16 }
  0x4c   :  { %v622_v7 = vpack.c.bf16 %v118_v6, %v117_v4  ;;  %v626_v10 = vpack.c.bf16 %v120_v9, %v119_v8  ;;  %v121_v23 = vld [vmem:[#allocation6 + $0x30] sm:$0xff]  ;;  %v122_v24 = vld [vmem:[#allocation6 + $0x38] sm:$0xff]  ;;  %v123_v26 = vld [vmem:[#allocation6 + $0x40] sm:$0xff]  ;;  %p822_p4 = scmp.ne.s32.totalorder %s443_s16, %s821_s19  ;;  %p827_p6 = scmp.lt.s32.totalorder %s821_s19, %s821_s19 }
  0x4d   :  { %619 = vmatprep.subr.bf16.mxu0 %v618_v5  ;;  %vm98_vm0 = vcmp.lt.s32.totalorder %v97_v12, 32  ;;  %v630_v25 = vpack.c.bf16 %v122_v24, %v121_v23  ;;  %v124_v27 = vld [vmem:[#allocation6 + $0x48] sm:$0xff]  ;;  %v125_v29 = vld [vmem:[#allocation6 + $0x50] sm:$0xff]  ;;  %v126_v30 = vld [vmem:[#allocation6 + $0x58] sm:$0xff] }
  0x4e   :  { %90 = vadd.xlane.f32.xlu0 %v87_v1  ;;  %621 = vmatpush3.bf16.msra.mxu0 %v618_v5  ;;  %v634_v28 = vpack.c.bf16 %v124_v27, %v123_v26  ;;  %v638_v31 = vpack.c.bf16 %v126_v30, %v125_v29  ;;  %v127_v32 = vld [vmem:[#allocation6 + $0x60] sm:$0xff]  ;;  %v128_v33 = vld [vmem:[#allocation6 + $0x68] sm:$0xff]  ;;  %v129_v34 = vld [vmem:[#allocation6 + $0x70] sm:$0xff]  ;;  %p828_p7 = por %p827_p6, %p826_p5 }
  0x4f   :  { %623 = vmatprep.subr.bf16.mxu0 %v622_v7  ;;  %v642_v35 = vpack.c.bf16 %v128_v33, %v127_v32  ;;  %v130_v36 = vld [vmem:[#allocation6 + $0x78] sm:$0xff]  ;;  %v223_v38 = vld [vmem:[#allocation8] sm:$0xff]  ;;  %v224_v39 = vld [vmem:[#allocation8 + $0x8] sm:$0xff] }
  0x50   :  { %v646_v37 = vpack.c.bf16 %v130_v36, %v129_v34  ;;  %v225_v40 = vld [vmem:[#allocation8 + $0x10] sm:$0xff]  ;;  %v650_v41 = vpack.c.bf16 %v224_v39, %v223_v38  ;;  %v226_v42 = vld [vmem:[#allocation8 + $0x18] sm:$0xff]  ;;  %v227_v44 = vld [vmem:[#allocation8 + $0x20] sm:$0xff]  ;;  %p829_p8 = pnand %p828_p7, %p822_p4 }
  0x51   :  { %v654_v43 = vpack.c.bf16 %v226_v42, %v225_v40  ;;  %v228_v45 = vld [vmem:[#allocation8 + $0x28] sm:$0xff]  ;;  %v229_v57 = vld [vmem:[#allocation8 + $0x30] sm:$0xff]  ;;  %v230_v58 = vld [vmem:[#allocation8 + $0x38] sm:$0xff] }
  0x52   :  { %625 = vmatpush3.bf16.msra.mxu0 %v622_v7  ;;  %651 = vmatprep.subr.bf16.mxu1 %v650_v41  ;;  %v658_v46 = vpack.c.bf16 %v228_v45, %v227_v44  ;;  %v662_v59 = vpack.c.bf16 %v230_v58, %v229_v57  ;;  %v231_v60 = vld [vmem:[#allocation8 + $0x40] sm:$0xff]  ;;  %v232_v61 = vld [vmem:[#allocation8 + $0x48] sm:$0xff]  ;;  %v233_v63 = vld [vmem:[#allocation8 + $0x50] sm:$0xff] }
  0x53   :  { %627 = vmatprep.subr.bf16.mxu0 %v626_v10  ;;  %653 = vmatpush3.bf16.msra.mxu1 %v650_v41  ;;  %v666_v62 = vpack.c.bf16 %v232_v61, %v231_v60  ;;  %v235_v2 = vld [vmem:[#allocation8 + $0x60] sm:$0xff]  ;;  %v236_v3 = vld [vmem:[#allocation8 + $0x68] sm:$0xff]  ;;  %v237_v5 = vld [vmem:[#allocation8 + $0x70] sm:$0xff] }
  0x54   :  { %655 = vmatprep.subr.bf16.mxu1 %v654_v43  ;;  %v674_v4 = vpack.c.bf16 %v236_v3, %v235_v2  ;;  %v238_v6 = vld [vmem:[#allocation8 + $0x78] sm:$0xff]  ;;  %v331_v8 = vld [vmem:[#allocation9] sm:$0xff]  ;;  %v332_v9 = vld [vmem:[#allocation9 + $0x8] sm:$0xff] }
  0x55   :  { %v678_v7 = vpack.c.bf16 %v238_v6, %v237_v5  ;;  %v682_v11 = vpack.c.bf16 %v332_v9, %v331_v8  ;;  %v334_v12 = vld [vmem:[#allocation9 + $0x18] sm:$0xff]  ;;  %v337_v32 = vld [vmem:[#allocation9 + $0x30] sm:$0xff]  ;;  %v340_v36 = vld [vmem:[#allocation9 + $0x48] sm:$0xff] }
  0x56   :  { %629 = vmatpush3.bf16.msra.mxu0 %v626_v10  ;;  %v333_v10 = vld [vmem:[#allocation9 + $0x10] sm:$0xff]  ;;  %v338_v33 = vld [vmem:[#allocation9 + $0x38] sm:$0xff]  ;;  %v343_v41 = vld [vmem:[#allocation9 + $0x60] sm:$0xff] }
  0x57   :  { %631 = vmatprep.subr.bf16.mxu0 %v630_v25  ;;  %657 = vmatpush3.bf16.msra.mxu1 %v654_v43  ;;  %v694_v34 = vpack.c.bf16 %v338_v33, %v337_v32  ;;  %v341_v38 = vld [vmem:[#allocation9 + $0x50] sm:$0xff]  ;;  %v342_v39 = vld [vmem:[#allocation9 + $0x58] sm:$0xff]  ;;  %v344_v42 = vld [vmem:[#allocation9 + $0x68] sm:$0xff] }
  0x58   :  { %659 = vmatprep.subr.bf16.mxu1 %v658_v46  ;;  %v702_v40 = vpack.c.bf16 %v342_v39, %v341_v38  ;;  %v706_v43 = vpack.c.bf16 %v344_v42, %v343_v41  ;;  %v345_v44 = vld [vmem:[#allocation9 + $0x70] sm:$0xff]  ;;  %v346_v45 = vld [vmem:[#allocation9 + $0x78] sm:$0xff] }
  0x5a   :  { %633 = vmatpush3.bf16.msra.mxu0 %v630_v25 }
  0x5b   :  { %635 = vmatprep.subr.bf16.mxu0 %v634_v28  ;;  %661 = vmatpush3.bf16.msra.mxu1 %v658_v46  ;;  %v710_v46 = vpack.c.bf16 %v346_v45, %v345_v44 }
  0x5c   :  { %663 = vmatprep.subr.bf16.mxu1 %v662_v59 }
  0x5e   :  { %637 = vmatpush3.bf16.msra.mxu0 %v634_v28 }
  0x5f   :  { %639 = vmatprep.subr.bf16.mxu0 %v638_v31  ;;  %665 = vmatpush3.bf16.msra.mxu1 %v662_v59 }
  0x60   :  { %667 = vmatprep.subr.bf16.mxu1 %v666_v62 }
  0x62   :  { %641 = vmatpush3.bf16.msra.mxu0 %v638_v31 }
  0x63   :  { %643 = vmatprep.subr.bf16.mxu0 %v642_v35  ;;  %669 = vmatpush3.bf16.msra.mxu1 %v666_v62  ;;  %v430_v62 = vstv %s1004_s0 }
  0x66   :  { %645 = vmatpush3.bf16.msra.mxu0 %v642_v35  ;;  %v339_v35 = vld [vmem:[#allocation9 + $0x40] sm:$0xff] }
  0x67   :  { %647 = vmatprep.subr.bf16.mxu0 %v646_v37 }
  0x6a   :  { %649 = vmatpush3.bf16.msra.mxu0 %v646_v37  ;;  %v698_v37 = vpack.c.bf16 %v340_v36, %v339_v35 }
  0x6b   :  { %683 = vmatprep.subr.bf16.mxu0 %v682_v11 }
  0xd7   :  { %v89_v13 = vpop.xlane.xlu0 %88 }
  0xd8   :  { %v92_v14 = vmul.f32 0.03125, %v89_v13  ;;  %v686_v13 = vpack.c.bf16 %v334_v12, %v333_v10 }
  0xda   :  { %v94_v15 = vsub.f32 %v86_v0, %v92_v14  ;;  %v234_v0 = vld [vmem:[#allocation8 + $0x58] sm:$0xff]  ;;  %v335_v14 = vld [vmem:[#allocation9 + $0x20] sm:$0xff] }
  0xdb   :  { %v91_v16 = vpop.xlane.xlu0 %90 }
  0xdc   :  { %v93_v17 = vmul.f32 0.03125, %v91_v16  ;;  %v99_v18 = vsel %vm98_vm0, %v94_v15, 0.0  ;;  %v336_v15 = vld [vmem:[#allocation9 + $0x28] sm:$0xff] }
  0xdd   :  { %v101_v19 = vmul.f32 %v99_v18, %v99_v18  ;;  %v690_v16 = vpack.c.bf16 %v336_v15, %v335_v14 }
  0xde   :  { %v95_v20 = vsub.f32 %v87_v1, %v93_v17  ;;  %v670_v1 = vpack.c.bf16 %v234_v0, %v233_v63  ;;  %v456_v17 = vld [vmem:[%s1007_s3] ss:$0 sm:$0xff] }
  0xdf   :  { %103 = vadd.xlane.f32.xlu1 %v101_v19  ;;  %v458_v63 = vld [vmem:[%s1011_s7] ss:$0 sm:$0xff] }
  0xe0   :  { %v100_v21 = vsel %vm98_vm0, %v95_v20, 0.0  ;;  %671 = vmatprep.subr.bf16.mxu1 %v670_v1 }
  0xe1   :  { %v102_v22 = vmul.f32 %v100_v21, %v100_v21  ;;  %673 = vmatpush3.bf16.msra.mxu1 %v670_v1 }
  0xe2   :  { %675 = vmatprep.subr.bf16.mxu1 %v674_v4 }
  0xe3   :  { %105 = vadd.xlane.f32.xlu1 %v102_v22 }
  0xe5   :  { %677 = vmatpush3.bf16.msra.mxu1 %v674_v4 }
  0xe6   :  { %679 = vmatprep.subr.bf16.mxu1 %v678_v7 }
  0xe9   :  { %681 = vmatpush3.bf16.msra.mxu1 %v678_v7 }
 0x16c   :  { %v104_v47 = vpop.xlane.xlu1 %103 }
 0x16d   :  { %v107_v48 = vmul.f32 0.03125, %v104_v47  ;;  %v457_v47 = vld [vmem:[%s1009_s5] ss:$0 sm:$0xff] }
 0x16f   :  { %v109_v49 = vadd.f32 1e-05, %v107_v48 }
 0x170   :  { %v106_v50 = vpop.xlane.xlu1 %105 }
 0x171   :  { %721 = vrsqrt.f32 %v109_v49  ;;  %v108_v51 = vmul.f32 0.03125, %v106_v50 }
 0x173   :  { %v110_v52 = vadd.f32 1e-05, %v108_v51 }
 0x175   :  { %723 = vrsqrt.f32 %v110_v52 }
 0x17b   :  { %v722_v53 = vpop.eup %721 }
 0x17c   :  { %v113_v54 = vmul.f32 %v722_v53, %v99_v18 }
 0x17e   :  { %545 = vmatprep.mubr.f32.mxu0 %v113_v54 }
 0x17f   :  { %v724_v55 = vpop.eup %723 }
 0x180   :  { %v114_v56 = vmul.f32 %v724_v55, %v100_v21 }
 0x182   :  { %546 = vmatmul.mubr.f32.vlgmr.msra.gmra.mrb[0].mxu0 %v114_v56 }
 0x183   :  { %685 = vmatpush3.bf16.msra.mxu0 %v682_v11 }
 0x184   :  { %687 = vmatprep.subr.bf16.mxu0 %v686_v13 }
 0x187   :  { %689 = vmatpush3.bf16.msra.mxu0 %v686_v13 }
 0x188   :  { %691 = vmatprep.subr.bf16.mxu0 %v690_v16 }
 0x18b   :  { %693 = vmatpush3.bf16.msra.mxu0 %v690_v16 }
 0x18c   :  { %695 = vmatprep.subr.bf16.mxu0 %v694_v34 }
 0x18f   :  { %697 = vmatpush3.bf16.msra.mxu0 %v694_v34 }
 0x190   :  { %699 = vmatprep.subr.bf16.mxu0 %v698_v37 }
 0x193   :  { %701 = vmatpush3.bf16.msra.mxu0 %v698_v37 }
 0x194   :  { %703 = vmatprep.subr.bf16.mxu0 %v702_v40 }
 0x197   :  { %705 = vmatpush3.bf16.msra.mxu0 %v702_v40 }
 0x198   :  { %707 = vmatprep.subr.bf16.mxu0 %v706_v43 }
 0x19b   :  { %709 = vmatpush3.bf16.msra.mxu0 %v706_v43 }
 0x19c   :  { %711 = vmatprep.subr.bf16.mxu0 %v710_v46 }
 0x19f   :  { %713 = vmatpush3.bf16.msra.mxu0 %v710_v46 }
 0x255   :  { %v547_v18 = vpop.f32.mrb[0].mxu0 }
 0x256   :  { %v210_v19 = vadd.f32 %v547_v18, %v456_v17  ;;  %v204_v20 = vpop.f32.mrb[1].mxu0 }
 0x257   :  { %v205_v21 = vadd.f32 %v456_v17, %v204_v20 }
 0x258   :  { %v216_v22 = vmul.f32 0.70710677, %v210_v19  ;;  %v214_v29 = vmul.f32 0.5, %v210_v19 }
 0x259   :  { %v215_v23 = vmul.f32 0.70710677, %v205_v21  ;;  %v213_v27 = vmul.f32 0.5, %v205_v21 }
 0x25a   :  { %725 = verf.f32 %v216_v22 }
 0x25b   :  { %727 = verf.f32 %v215_v23 }
 0x264   :  { %v726_v24 = vpop.eup %725 }
 0x265   :  { %v728_v25 = vpop.eup %727  ;;  %v220_v26 = vadd.f32 1.0, %v726_v24 }
 0x266   :  { %v219_v28 = vadd.f32 1.0, %v728_v25 }
 0x267   :  { %v222_v31 = vmul.f32 %v220_v26, %v214_v29 }
 0x268   :  { %v221_v30 = vmul.f32 %v219_v28, %v213_v27 }
 0x269   :  { %v432_v2 = vmul.f32 %v430_v62, %v222_v31 }
 0x26a   :  { %580 = vmatprep.mubr.f32.mxu1 %v221_v30  ;;  %v431_v4 = vmul.f32 %v430_v62, %v221_v30 }
 0x26b   :  { %581 = vmatmul.mubr.f32.vlgmr.msra.gmra.mrb[0].mxu1 %v222_v31 }
 0x33e   :  { %v582_v48 = vpop.f32.mrb[0].mxu1 }
 0x33f   :  { %v318_v49 = vadd.f32 %v582_v48, %v457_v47  ;;  %v312_v50 = vpop.f32.mrb[1].mxu1 }
 0x340   :  { %v313_v51 = vadd.f32 %v457_v47, %v312_v50 }
 0x341   :  { %v324_v52 = vmul.f32 0.70710677, %v318_v49  ;;  %v322_v59 = vmul.f32 0.5, %v318_v49 }
 0x342   :  { %v323_v53 = vmul.f32 0.70710677, %v313_v51  ;;  %v321_v57 = vmul.f32 0.5, %v313_v51 }
 0x343   :  { %729 = verf.f32 %v324_v52 }
 0x344   :  { %731 = verf.f32 %v323_v53 }
 0x34d   :  { %v730_v54 = vpop.eup %729 }
 0x34e   :  { %v732_v55 = vpop.eup %731  ;;  %v328_v56 = vadd.f32 1.0, %v730_v54 }
 0x34f   :  { %v327_v58 = vadd.f32 1.0, %v732_v55 }
 0x350   :  { %v330_v61 = vmul.f32 %v328_v56, %v322_v59 }
 0x351   :  { %v329_v60 = vmul.f32 %v327_v58, %v321_v57 }
 0x353   :  { %615 = vmatprep.mubr.f32.mxu0 %v329_v60 }
 0x354   :  { %616 = vmatmul.mubr.f32.vlgmr.msra.gmra.mrb[2].mxu0 %v330_v61 }
 0x427   :  { %v617_v0 = vpop.f32.mrb[2].mxu0 }
 0x428   :  { %v426_v1 = vadd.f32 %v617_v0, %v458_v63  ;;  %v420_v3 = vpop.f32.mrb[3].mxu0 }
 0x429   :  { %v421_v5 = vadd.f32 %v458_v63, %v420_v3 }
 0x42a   :  { %v434_v6 = vadd.f32 %v432_v2, %v426_v1 }
 0x42b   :  { %v433_v7 = vadd.f32 %v431_v4, %v421_v5 }
 0x42c   :  { %436 = vst [vmem:[#allocation11 + $0x8] sm:$0xff] %v434_v6 }
 0x42d   :  { %435 = vst [vmem:[#allocation11] sm:$0xff] %v433_v7 }
 0x42e   :  { %832 = shalt.err (!%p829_p8)
}
 0x42f   :  { %s833_s20 = scalar_lea.hbm %s1012_s8, 256 }
 0x430   :  { %p834_p9 = scmp.ne.s32.totalorder %s1012_s8, %s833_s20  ;;  %p837_p10 = scmp.lt.u32.totalorder %s833_s20, %s1012_s8 }
 0x432   :  { %p839_p11 = pnand %p837_p10, %p834_p9 }
 0x434   :  { %842 = shalt.err (!%p839_p11)
}
 0x435   :  { %448 = dma.vmem_to_hbm [thread:$0]  %s443_s16, 256, %s1012_s8, [#allocation5], %s853_s17, %s853_s17, %s854_s18  }
 0x436   :  { %849 = dma.done.wait [#allocation5], 256  }
 0x437   :  { %850 = vsyncadd [#allocation5], 4294967040 }
 0x438   :  { %452 = vsyncpa [#allocation4], 1 }
 0x439   :  { %453 = vsyncpa [#allocation7], 1 }
 0x43a   :  { %454 = vsyncpa [#allocation10], 1 }
 0x43b   :  { %455 = vsyncpa [#allocation5], 1 }

</bundles_post_ra>
